<compile_context>
chip_gen: v5e
topology: v5e:2x2
jax: 0.10.0
libtpu: 0.0.40
codegen_flags: <defaults>
</compile_context>

<pallas_src>
import jax
import jax.numpy as jnp
from jax.experimental import pallas as pl
from jax.experimental.pallas import tpu as pltpu

_LANES = 128
_SUBLANES = 8


# ---------------------------------------------------------------------------
# Kernels
# ---------------------------------------------------------------------------
def _bias_sigmoid_kernel(bias_ref, x_ref, o_ref):
    # bias_ref: SMEM scalar (1,) f32; x_ref/o_ref: (TB, 128) VMEM tiles.
    z = x_ref[...].astype(jnp.float32) + bias_ref[0]
    o_ref[...] = jax.nn.sigmoid(z).astype(o_ref.dtype)


def _bias_kernel(bias_ref, x_ref, o_ref):
    z = x_ref[...].astype(jnp.float32) + bias_ref[0]
    o_ref[...] = z.astype(o_ref.dtype)


def _sigmoid_kernel(x_ref, o_ref):
    o_ref[...] = jax.nn.sigmoid(x_ref[...].astype(jnp.float32)).astype(o_ref.dtype)


# ---------------------------------------------------------------------------
# Tiling / dispatch helpers
# ---------------------------------------------------------------------------
def _device_kind():
    try:
        return jax.devices()[0].device_kind.lower()
    except Exception:
        return ""


def _is_v7():
    return "v7" in _device_kind()


def _tile_rows(rows, itemsize):
    """Rows per grid step: ~2 MiB tiles (4 MiB on v7x), scaled by dtype."""
    target_bytes = (4 << 20) if _is_v7() else (2 << 20)
    tb = target_bytes // (_LANES * itemsize)          # e.g. f32 -> 4096, bf16 -> 8192
    tb = max(_SUBLANES, (tb // _SUBLANES) * _SUBLANES)  # multiple of 8
    if rows <= tb:
        return rows                                   # full-dim block (always legal)
    return tb                                         # multiple-of-8 block


def _run_elementwise(kernel, x_slab, bias, *, transcendental):
    """Run `kernel` over a lane-dense (rows, 128) slab with a tiled 1-D grid."""
    rows, lanes = x_slab.shape
    itemsize = jnp.dtype(x_slab.dtype).itemsize
    tb = _tile_rows(rows, itemsize)
    num_blocks = pl.cdiv(rows, tb)

    in_specs = []
    args = []
    if bias is not None:
        in_specs.append(pl.BlockSpec(memory_space=pltpu.MemorySpace.SMEM))
        args.append(bias)
    in_specs.append(pl.BlockSpec((tb, lanes), lambda i: (i, 0)))
    args.append(x_slab)

    total = rows * lanes
    cost = pl.CostEstimate(
        flops=total,
        transcendentals=total if transcendental else 0,
        bytes_accessed=2 * total * itemsize + (4 if bias is not None else 0),
    )

    def call(dim_sem):
        return pl.pallas_call(
            kernel,
            out_shape=jax.ShapeDtypeStruct((rows, lanes), x_slab.dtype),
            grid=(num_blocks,),
            in_specs=in_specs,
            out_specs=pl.BlockSpec((tb, lanes), lambda i: (i, 0)),
            compiler_params=pltpu.CompilerParams(dimension_semantics=dim_sem),
            cost_estimate=cost,
        )(*args)

    # Only CORE_PARALLEL (not plain "parallel") actually shards the grid
    # across v7x's two TensorCores.
    if _is_v7() and num_blocks >= 2:
        try:
            return call((pltpu.CORE_PARALLEL,))
        except Exception:
            pass  # fall back to single-core semantics below
    return call(("parallel",))


# ---------------------------------------------------------------------------
# Public wrapper (PredictionLayer.forward)
# ---------------------------------------------------------------------------
def prediction_layer(x, bias=None, *, task="binary", use_bias=True):
    """Pallas implementation of PredictionLayer.forward.

    x    : any-shaped float array (typically (B, 1) or (B, N))
    bias : (1,) float (required iff use_bias=True)
    """
    if task not in ("binary", "multiclass", "regression"):
        raise ValueError("task must be binary,multiclass or regression")

    apply_sigmoid = task == "binary"

    # Identity fast path: nothing to compute, skip the HBM round trip.
    if not use_bias and not apply_sigmoid:
        return x

    if use_bias and bias is None:
        raise ValueError("use_bias=True requires a bias parameter of shape (1,)")

    # Lane-dense repack. Padding (and the matching output slice) only fire
    # when total is not already a multiple of 128 — avoids two extra full
    # HBM passes in the common CTR case.
    orig_shape = x.shape
    flat = x.reshape(-1)
    total = flat.shape[0]
    padded = pl.cdiv(total, _LANES) * _LANES
    if padded != total:
        flat = jnp.pad(flat, (0, padded - total))
    slab = flat.reshape(padded // _LANES, _LANES)

    if use_bias:
        b = jnp.asarray(bias, dtype=jnp.float32).reshape(1)
        kernel = _bias_sigmoid_kernel if apply_sigmoid else _bias_kernel
        out_slab = _run_elementwise(kernel, slab, b, transcendental=apply_sigmoid)
    else:
        out_slab = _run_elementwise(_sigmoid_kernel, slab, None, transcendental=True)

    out_flat = out_slab.reshape(-1)
    if padded != total:
        out_flat = out_flat[:total]
    return out_flat.reshape(orig_shape)


# ---------------------------------------------------------------------------
# Self-test
# ---------------------------------------------------------------------------
if __name__ == "__main__":
    key = jax.random.PRNGKey(0)
    bias = jnp.zeros((1,), dtype=jnp.float32) + 0.1

    # Case 1: DeepCTR-style num_outputs=1 head -> exercises pad path (total=16).
    x1 = jax.random.normal(key, (16, 1), dtype=jnp.float32)
    out1 = jax.block_until_ready(prediction_layer(x1, bias, task="binary", use_bias=True))
    ref1 = jax.nn.sigmoid(x1 + bias[0])
    assert out1.shape == x1.shape and out1.dtype == x1.dtype
    assert jnp.max(jnp.abs(out1 - ref1)) < 1e-6

    # Case 2: lane-aligned head (8, 128) -> no pad, single block.
    x2 = jax.random.normal(jax.random.PRNGKey(1), (8, 128), dtype=jnp.float32)
    out2 = jax.block_until_ready(prediction_layer(x2, bias, task="binary", use_bias=True))
    ref2 = jax.nn.sigmoid(x2 + bias[0])
    assert jnp.max(jnp.abs(out2 - ref2)) < 1e-6

    # Case 3: multi-block grid with a partial last block (5000 rows, tb=4096).
    x3 = jax.random.normal(jax.random.PRNGKey(2), (5000, 128), dtype=jnp.float32)
    out3 = jax.block_until_ready(prediction_layer(x3, bias, task="binary", use_bias=True))
    ref3 = jax.nn.sigmoid(x3 + bias[0])
    assert jnp.max(jnp.abs(out3 - ref3)) < 1e-6

    # Case 4: non-lane-multiple total (7*5=35) -> pad + slice path.
    x4 = jax.random.normal(jax.random.PRNGKey(3), (7, 5), dtype=jnp.float32)
    out4 = jax.block_until_ready(prediction_layer(x4, bias, task="binary", use_bias=True))
    ref4 = jax.nn.sigmoid(x4 + bias[0])
    assert out4.shape == x4.shape
    assert jnp.max(jnp.abs(out4 - ref4)) < 1e-6

    # Case 5: bf16 input -> f32 compute, bf16 store, dtype-scaled tile rows.
    x5 = jax.random.normal(jax.random.PRNGKey(4), (8, 128)).astype(jnp.bfloat16)
    out5 = jax.block_until_ready(prediction_layer(x5, bias, task="binary", use_bias=True))
    ref5 = jax.nn.sigmoid(x5.astype(jnp.float32) + bias[0]).astype(jnp.bfloat16)
    assert out5.dtype == jnp.bfloat16
    assert jnp.max(jnp.abs(out5.astype(jnp.float32) - ref5.astype(jnp.float32))) < 1e-2

    # Case 6: regression with bias -> bias add only, no sigmoid.
    x6 = jax.random.normal(jax.random.PRNGKey(5), (16, 1), dtype=jnp.float32)
    out6 = jax.block_until_ready(prediction_layer(x6, bias, task="regression", use_bias=True))
    ref6 = x6 + bias[0]
    assert jnp.max(jnp.abs(out6 - ref6)) < 1e-6

    # Case 7: regression without bias -> identity fast path (no kernel launch).
    x7 = jax.random.normal(jax.random.PRNGKey(6), (8, 128), dtype=jnp.float32)
    out7 = jax.block_until_ready(prediction_layer(x7, None, task="regression", use_bias=False))
    assert jnp.array_equal(out7, x7)

    print("KERNEL_OK")
</pallas_src>

<mosaic_0001>
module attributes {stable_mosaic.version = 11 : i64} {
  func.func @_bias_sigmoid_kernel(%arg0: i32, %arg1: memref<1xf32, #tpu.memory_space<smem>>, %arg2: memref<1x128xf32, #tpu.memory_space<vmem>>, %arg3: memref<1x128xf32, #tpu.memory_space<vmem>>) attributes {dimension_semantics = [#tpu.dimension_semantics<parallel>], iteration_bounds = array<i64: 1>, scalar_prefetch = 0 : i64, scratch_operands = 0 : i64, tpu.core_type = #tpu.core_type<tc>, window_params = [{transform_indices = @transform_0, window_bounds = array<i64: 1>}, {transform_indices = @transform_1, window_bounds = array<i64: 1, 128>}, {transform_indices = @transform_2, window_bounds = array<i64: 1, 128>}]} {
    %c0 = arith.constant 0 : index
    %c0_0 = arith.constant 0 : index
    %0 = vector.load %arg2[%c0, %c0_0] : memref<1x128xf32, #tpu.memory_space<vmem>>, vector<1x128xf32>
    %c0_1 = arith.constant 0 : index
    %1 = memref.load %arg1[%c0_1] : memref<1xf32, #tpu.memory_space<smem>>
    %2 = vector.broadcast %1 : f32 to vector<1x128xf32>
    %3 = arith.addf %0, %2 : vector<1x128xf32>
    %4 = arith.negf %3 : vector<1x128xf32>
    %5 = math.exp %4 : vector<1x128xf32>
    %cst = arith.constant 1.000000e+00 : f32
    %6 = vector.broadcast %cst : f32 to vector<1x128xf32>
    %7 = arith.addf %6, %5 : vector<1x128xf32>
    %8 = arith.divf %6, %7 : vector<1x128xf32>
    %c0_2 = arith.constant 0 : index
    %c0_3 = arith.constant 0 : index
    %9 = vector.load %arg3[%c0_2, %c0_3] : memref<1x128xf32, #tpu.memory_space<vmem>>, vector<1x128xf32>
    tpu.vector_store %arg3[%c0_2, %c0_3], %8 {strides = array<i32>} : memref<1x128xf32, #tpu.memory_space<vmem>>, vector<1x128xf32>,
    return
  }
  func.func @transform_0(%arg0: i32) -> i32 {
    %c0_i32 = arith.constant 0 : i32
    %c0_i32_0 = arith.constant 0 : i32
    return %c0_i32 : i32
  }
  func.func @transform_1(%arg0: i32) -> (i32, i32) {
    %c0_i32 = arith.constant 0 : i32
    %c0_i32_0 = arith.constant 0 : i32
    return %arg0, %c0_i32 : i32, i32
  }
  func.func @transform_2(%arg0: i32) -> (i32, i32) {
    %c0_i32 = arith.constant 0 : i32
    %c0_i32_0 = arith.constant 0 : i32
    return %arg0, %c0_i32 : i32, i32
  }
}

</mosaic_0001>

<bundles_post_ra>
// kernel: tpu_custom_call.1
= control target key start
LH: loop header
LB: loop body
LE: loop exit
PB: predicated region body
PF: predicated region fallthrough
CT: control target
= control target key end

     0   :  { %s110_s0 = inlined_call_operand.<no memory space> [shape: f32[1], index: 0, kind: input, shape index: {}]   ;;  %s111_s1 = inlined_call_operand.vmem [shape: f32[1,128], index: 1, kind: input, shape index: {}]   ;;  %s112_s2 = inlined_call_operand.hbm [shape: f32[1,128], index: 2, kind: output, shape index: {}]  }
   0x1   :  { %v13_v0 = vld [vmem:[%s111_s1] sm:$0x1]  ;;  %v15_v1 = vstv %s110_s0 }
   0x2   :  { %8 = vsyncpa [#allocation4], 0  ;;  %v16_v2 = vadd.f32 %v15_v1, %v13_v0  ;;  %s85_s1 = smov [#allocation3]   ;;  %s44_s15 = sshll.u32 %s112_s2, 4  ;;  %s45_s15 = int_to_ptr.hbm [resolvable:$true] %s44_s15 }
   0x3   :  { %s42_s13 = sshll.u32 %s85_s1, 4  ;;  %s43_s13 = int_to_ptr.vmem [resolvable:$true] %s42_s13 }
   0x4   :  { %v53_v3 = vmul.f32 -1.442695, %v16_v2 }
   0x6   :  { %55 = vpow2.f32 %v53_v3 }
   0xc   :  { %v56_v4 = vpop.eup %55 }
   0xd   :  { %v20_v5 = vadd.f32 1.0, %v56_v4 }
   0xf   :  { %57 = vrcp.f32 %v20_v5  ;;  %v32_v8 = vand.u32 2147483648, %v20_v5  ;;  %vm26_vm0 = vweird.f32 %v20_v5  ;;  %v30_v10 = vand.u32 2147483647, %v20_v5 }
  0x11   :  { %v33_v12 = vor.u32 1.1754944e-38, %v32_v8  ;;  %vm31_vm3 = vcmp.eq.f32.partialorder %v30_v10, 8.507059e+37 }
  0x15   :  { %v58_v6 = vpop.eup %57 }
  0x16   :  { %v22_v7 = vmul.f32 %v58_v6, %v20_v5  ;;  %vm27_vm1 = vweird.f32 %v58_v6 }
  0x17   :  { %vm28_vm2 = vmor %vm26_vm0, %vm27_vm1 }
  0x18   :  { %v23_v9 = vsub.f32 1.0, %v22_v7 }
  0x1a   :  { %v24_v11 = vmul.f32 %v58_v6, %v23_v9 }
  0x1c   :  { %v25_v13 = vadd.f32 %v58_v6, %v24_v11 }
  0x1e   :  { %v29_v14 = vsel %vm28_vm2, %v58_v6, %v25_v13 }
  0x1f   :  { %v34_v15 = vsel %vm31_vm3, %v33_v12, %v29_v14 }
  0x20   :  { %36 = vst [vmem:[#allocation3] sm:$0x1] %v34_v15 }
  0x21   :  { %47 = dma.vmem_to_hbm [thread:$0]  %s43_s13, 16, %s45_s15, [#allocation4]  }
  0x22   :  { %83 = dma.done.wait [#allocation4], 16  }
  0x23   :  { %84 = vsyncadd [#allocation4], 4294967280 }
  0x24   :  { %52 = vsyncpa [#allocation4], 1 }

</bundles_post_ra>
